<compile_context>
chip_gen: v6e
topology: v6e:2x2x1
jax: 0.10.0
libtpu: 0.0.40
codegen_flags: <defaults>
</compile_context>

<pallas_src>
import functools

import jax
import jax.numpy as jnp
from jax.experimental import pallas as pl
from jax.experimental.pallas import tpu as pltpu

_LANE = 128


def _layernorm_kernel(x_ref, a_ref, b_ref, o_ref, *, eps, f_real):
    x = x_ref[...].astype(jnp.float32)                 # (tile_rows, f_pad)
    f_pad = x.shape[-1]
    # Padded lanes of x are exactly zero, so a plain sum already gives the
    # real-lane sum; only the variance needs an explicit lane mask
    # (d = -mean in padded lanes).
    mean = jnp.sum(x, axis=-1, keepdims=True) * (1.0 / f_real)
    d = x - mean
    if f_pad != f_real:
        lane = jax.lax.broadcasted_iota(jnp.int32, (1, f_pad), 1)
        dm = jnp.where(lane < f_real, d, 0.0)
    else:
        dm = d
    # torch.std default is unbiased (Bessel correction, ddof=1).
    denom = max(f_real - 1, 1)                          # guard f == 1
    var = jnp.sum(dm * dm, axis=-1, keepdims=True) * (1.0 / denom)
    # Per-row reciprocal (shape (tile_rows, 1)); exact so the 1e-5 ref
    # tolerance holds.
    inv = 1.0 / (jnp.sqrt(var) + eps)
    o_ref[...] = ((d * inv) * a_ref[...] + b_ref[...]).astype(o_ref.dtype)


def _choose_row_tile(rows, f_pad, itemsize):
    """Row tile such that each in/out block is ~<=2 MiB, with >=8 grid steps
    when the row count allows (v7x dual-TC sharding + pipelining)."""
    # sublane packing: f32 -> 8, bf16 -> 16, int8/fp8 -> 32
    align = max(8, 32 // max(itemsize, 1))
    target_block_bytes = 2 * 1024 * 1024
    t = target_block_bytes // max(f_pad * itemsize, 1)
    t = max(align, (t // align) * align)
    if rows >= 8 * align:
        t = min(t, pl.cdiv(pl.cdiv(rows, 8), align) * align)
    elif rows > align:
        t = min(t, pl.cdiv(pl.cdiv(rows, 2), align) * align)
    t = min(t, pl.cdiv(rows, align) * align)
    return max(t, align)


def _vmem_limit_bytes(row_tile, f_pad, itemsize):
    """Scoped-VMEM limit derived from the actual kernel footprint:
    double-buffered in/out blocks + ~3 full-tile f32 temporaries + params."""
    blocks = 2 * 2 * row_tile * f_pad * itemsize        # in + out, x2 buffered
    temps = 3 * row_tile * f_pad * 4                    # f32 x, d, y temporaries
    params = 2 * 2 * f_pad * 4                          # gamma/beta blocks
    want = blocks + temps + params + (2 << 20)          # slack
    try:
        cap = int(pltpu.get_tpu_info().vmem_capacity_bytes)
    except Exception:  # interpret mode / older runtimes
        cap = 64 * 1024 * 1024                          # smallest (v7x per-TC)
    # Never ask for more than ~3/4 of physical VMEM; the ~2 MiB block cap
    # keeps `want` well under this on every generation.
    return int(min(max(want, 16 << 20), (cap * 3) // 4))


def layer_norm(x, a_2, b_2, eps=1e-6, *, row_tile=None):
    """x: (..., features); a_2, b_2: (features,)"""
    orig_shape = x.shape
    features = orig_shape[-1]
    rows = 1
    for s in orig_shape[:-1]:
        rows *= s
    x2d = x.reshape(rows, features)

    # Lane-dense layout: pad F to a multiple of 128 (no-op if already aligned).
    f_pad = pl.cdiv(features, _LANE) * _LANE
    if f_pad != features:
        x2d = jnp.pad(x2d, ((0, 0), (0, f_pad - features)))
        a2f = jnp.pad(a_2.astype(jnp.float32), (0, f_pad - features))
        b2f = jnp.pad(b_2.astype(jnp.float32), (0, f_pad - features))
    else:
        a2f = a_2.astype(jnp.float32)
        b2f = b_2.astype(jnp.float32)
    a2d = a2f.reshape(1, f_pad)   # resident f32 (1, F) blocks
    b2d = b2f.reshape(1, f_pad)

    itemsize = jnp.dtype(x.dtype).itemsize
    if row_tile is None:
        row_tile = _choose_row_tile(rows, f_pad, itemsize)

    # No host-side row pad: Pallas masks the ragged last row-block (rows are
    # independent, garbage in padded rows never reaches valid outputs).
    grid = (pl.cdiv(rows, row_tile),)
    out = pl.pallas_call(
        functools.partial(_layernorm_kernel, eps=eps, f_real=features),
        out_shape=jax.ShapeDtypeStruct((rows, f_pad), x.dtype),
        grid_spec=pltpu.PrefetchScalarGridSpec(
            num_scalar_prefetch=0,
            grid=grid,
            in_specs=[
                pl.BlockSpec((row_tile, f_pad), lambda i: (i, 0)),
                pl.BlockSpec((1, f_pad), lambda i: (0, 0)),
                pl.BlockSpec((1, f_pad), lambda i: (0, 0)),
            ],
            out_specs=pl.BlockSpec((row_tile, f_pad), lambda i: (i, 0)),
        ),
        compiler_params=pltpu.CompilerParams(
            dimension_semantics=("parallel",),
            vmem_limit_bytes=_vmem_limit_bytes(row_tile, f_pad, itemsize),
        ),
    )(x2d, a2d, b2d)

    if f_pad != features:
        out = out[:, :features]
    return out.reshape(orig_shape)


if __name__ == "__main__":
    batch, seq, features = 2, 8, 32
    key = jax.random.PRNGKey(0)
    x = jax.random.normal(key, (batch, seq, features), dtype=jnp.float32)

    # Deterministic parameter init matching the module's __init__.
    a_2 = jnp.ones((features,), dtype=jnp.float32)
    b_2 = jnp.zeros((features,), dtype=jnp.float32)
    eps = 1e-6

    out = layer_norm(x, a_2, b_2, eps)
    out = jax.block_until_ready(out)

    # Reference check in plain JAX (same unbiased-std semantics as torch).
    mean = jnp.mean(x, axis=-1, keepdims=True)
    std = jnp.sqrt(jnp.sum((x - mean) ** 2, axis=-1, keepdims=True) / (features - 1))
    ref = a_2 * (x - mean) / (std + eps) + b_2
    assert jnp.allclose(out, ref, atol=1e-5, rtol=1e-5), "mismatch vs reference"

    print("KERNEL_OK")
</pallas_src>

<mosaic_0001>
module attributes {stable_mosaic.version = 11 : i64} {
  func.func @_layernorm_kernel(%arg0: i32, %arg1: memref<8x128xf32, #tpu.memory_space<vmem>>, %arg2: memref<1x128xf32, #tpu.memory_space<vmem>>, %arg3: memref<1x128xf32, #tpu.memory_space<vmem>>, %arg4: memref<8x128xf32, #tpu.memory_space<vmem>>) attributes {dimension_semantics = [#tpu.dimension_semantics<parallel>], iteration_bounds = array<i64: 2>, scalar_prefetch = 0 : i64, scratch_operands = 0 : i64, tpu.core_type = #tpu.core_type<tc>, window_params = [{transform_indices = @transform_0, window_bounds = array<i64: 8, 128>}, {pipeline_mode = #tpu.pipeline_mode<synchronous>, transform_indices = @transform_1, window_bounds = array<i64: 1, 128>}, {pipeline_mode = #tpu.pipeline_mode<synchronous>, transform_indices = @transform_2, window_bounds = array<i64: 1, 128>}, {transform_indices = @transform_3, window_bounds = array<i64: 8, 128>}]} {
    %c0 = arith.constant 0 : index
    %c0_0 = arith.constant 0 : index
    %0 = vector.load %arg1[%c0, %c0_0] : memref<8x128xf32, #tpu.memory_space<vmem>>, vector<8x128xf32>
    %cst = arith.constant dense<0.000000e+00> : vector<8xf32>
    %1 = vector.multi_reduction <add>, %0, %cst [1] : vector<8x128xf32> to vector<8xf32>
    %2 = vector.shape_cast %1 : vector<8xf32> to vector<8x1xf32>
    %cst_1 = arith.constant 3.125000e-02 : f32
    %3 = vector.broadcast %cst_1 : f32 to vector<8x1xf32>
    %4 = arith.mulf %2, %3 : vector<8x1xf32>
    %5 = vector.broadcast %4 : vector<8x1xf32> to vector<8x128xf32>
    %6 = arith.subf %0, %5 : vector<8x128xf32>
    %7 = tpu.iota {dimensions = array<i32: 1>} : vector<1x128xi32>
    %c32_i32 = arith.constant 32 : i32
    %8 = vector.broadcast %c32_i32 : i32 to vector<1x128xi32>
    %9 = arith.cmpi slt, %7, %8 : vector<1x128xi32>
    %cst_2 = arith.constant 0.000000e+00 : f32
    %10 = vector.shape_cast %9 : vector<1x128xi1> to vector<1x128xi1>
    %11 = vector.broadcast %10 : vector<1x128xi1> to vector<8x128xi1>
    %12 = vector.broadcast %cst_2 : f32 to vector<8x128xf32>
    %13 = arith.select %11, %6, %12 : vector<8x128xi1>, vector<8x128xf32>
    %14 = arith.mulf %13, %13 : vector<8x128xf32>
    %cst_3 = arith.constant dense<0.000000e+00> : vector<8xf32>
    %15 = vector.multi_reduction <add>, %14, %cst_3 [1] : vector<8x128xf32> to vector<8xf32>
    %16 = vector.shape_cast %15 : vector<8xf32> to vector<8x1xf32>
    %cst_4 = arith.constant 0.0322580636 : f32
    %17 = vector.broadcast %cst_4 : f32 to vector<8x1xf32>
    %18 = arith.mulf %16, %17 : vector<8x1xf32>
    %19 = math.sqrt %18 : vector<8x1xf32>
    %cst_5 = arith.constant 9.99999997E-7 : f32
    %20 = vector.broadcast %cst_5 : f32 to vector<8x1xf32>
    %21 = arith.addf %19, %20 : vector<8x1xf32>
    %cst_6 = arith.constant 1.000000e+00 : f32
    %22 = vector.broadcast %cst_6 : f32 to vector<8x1xf32>
    %23 = arith.divf %22, %21 : vector<8x1xf32>
    %24 = vector.broadcast %23 : vector<8x1xf32> to vector<8x128xf32>
    %25 = arith.mulf %6, %24 : vector<8x128xf32>
    %c0_7 = arith.constant 0 : index
    %c0_8 = arith.constant 0 : index
    %26 = vector.load %arg2[%c0_7, %c0_8] : memref<1x128xf32, #tpu.memory_space<vmem>>, vector<1x128xf32>
    %27 = vector.broadcast %26 : vector<1x128xf32> to vector<8x128xf32>
    %28 = arith.mulf %25, %27 : vector<8x128xf32>
    %c0_9 = arith.constant 0 : index
    %c0_10 = arith.constant 0 : index
    %29 = vector.load %arg3[%c0_9, %c0_10] : memref<1x128xf32, #tpu.memory_space<vmem>>, vector<1x128xf32>
    %30 = vector.broadcast %29 : vector<1x128xf32> to vector<8x128xf32>
    %31 = arith.addf %28, %30 : vector<8x128xf32>
    %c0_11 = arith.constant 0 : index
    %c0_12 = arith.constant 0 : index
    %32 = vector.load %arg4[%c0_11, %c0_12] : memref<8x128xf32, #tpu.memory_space<vmem>>, vector<8x128xf32>
    tpu.vector_store %arg4[%c0_11, %c0_12], %31 {strides = array<i32>} : memref<8x128xf32, #tpu.memory_space<vmem>>, vector<8x128xf32>,
    return
  }
  func.func @transform_0(%arg0: i32) -> (i32, i32) {
    %c0_i32 = arith.constant 0 : i32
    %c0_i32_0 = arith.constant 0 : i32
    return %arg0, %c0_i32 : i32, i32
  }
  func.func @transform_1(%arg0: i32) -> (i32, i32) {
    %c0_i32 = arith.constant 0 : i32
    %c0_i32_0 = arith.constant 0 : i32
    %c0_i32_1 = arith.constant 0 : i32
    return %c0_i32, %c0_i32_0 : i32, i32
  }
  func.func @transform_2(%arg0: i32) -> (i32, i32) {
    %c0_i32 = arith.constant 0 : i32
    %c0_i32_0 = arith.constant 0 : i32
    %c0_i32_1 = arith.constant 0 : i32
    return %c0_i32, %c0_i32_0 : i32, i32
  }
  func.func @transform_3(%arg0: i32) -> (i32, i32) {
    %c0_i32 = arith.constant 0 : i32
    %c0_i32_0 = arith.constant 0 : i32
    return %arg0, %c0_i32 : i32, i32
  }
}

</mosaic_0001>

<bundles_post_ra>
// kernel: tpu_custom_call.1
= control target key start
LH: loop header
LB: loop body
LE: loop exit
PB: predicated region body
PF: predicated region fallthrough
CT: control target
= control target key end

     0   :  { %8 = vsyncpa [#allocation3], 0  ;;  %s644_s0 = inlined_call_operand.hbm [shape: f32[16,128], index: 0, kind: input, shape index: {}]   ;;  %s645_s1 = inlined_call_operand.vmem [shape: f32[1,128], index: 1, kind: input, shape index: {}]   ;;  %s646_s2 = inlined_call_operand.vmem [shape: f32[1,128], index: 2, kind: input, shape index: {}]   ;;  %s647_s3 = inlined_call_operand.hbm [shape: f32[16,128], index: 3, kind: output, shape index: {}]  }
   0x1   :  { %10 = vsyncpa [#allocation3 + $0x1], 0 }
   0x2   :  { %11 = vsyncpa [#allocation4], 0 }
   0x3   :  { %13 = vsyncpa [#allocation4 + $0x1], 0  ;;  %s493_s12 = smov 0   ;;  %s495_s13 = smov 0  }
   0x4   :  { %s497_s14 = smov 0   ;;  %s499_s15 = smov 0  }
   0x5 LB: > { %s514_s16 = sadd.s32 4294967295, %s469_s15   ;;  %s313_s17 = sadd.s32 4294967294, %s469_s15   ;;  %s469_s15 = sphi %s499_s15, %s664_s15   ;;  %s465_s14 = sphi %s497_s14, %s663_s14   ;;  %s461_s13 = sphi %s495_s13, %s662_s13   ;;  %s457_s12 = sphi %s493_s12, %s661_s12  }
   0x6   : > { %s518_s18 = sadd.s32 1, %s469_s15   ;;  %s26_s19 = sadd.s32 1, %s465_s14 }
   0x7   : > { %s23_s20 = ssub.s32 %s469_s15, %s518_s18  ;;  %p33_p0 = scmp.ne.s32.totalorder %s465_s14, %s461_s13 }
   0x8   : > { %p24_p1 = scmp.eq.s32.totalorder %s23_s20, 0  ;;  %p34_p2 = scmp.eq.s32.totalorder %s469_s15, 0 }
   0x9   : > { %p39_p3 = scmp.ne.s32.totalorder %s461_s13, %s457_s12  ;;  %p40_p4 = scmp.eq.s32.totalorder %s514_s16, 0 }
   0xa   : > { %s530_s21 = scalar_select %p24_p1, %s465_s14, %s26_s19  }
   0xb   : > { %p532_p5 = por %p34_p2, %p33_p0  ;;  %p536_p6 = por %p40_p4, %p39_p3 }
   0xc   : > { %p105_p7 = scmp.eq.s32.totalorder %s514_s16, 1  ;;  %p111_p8 = scmp.eq.s32.totalorder %s313_s17, 1 }
   0xd   : > { %s651_s23 = scalar_select %p536_p6, 1, 0 }
   0xe   : > { %p339_p10 = scmp.lt.s32.totalorder %s469_s15, 2  ;;  %p543_p11 = por %p105_p7, %p33_p0 }
   0xf   : > { %p547_p12 = por %p111_p8, %p39_p3  ;;  %s137_s26 = sand.u32 1, %s465_s14  }
  0x10   : > { %s652_s24 = scalar_select %p543_p11, 1, 0 }
  0x11   : > { %s653_s25 = scalar_select %p547_p12, 1, 0 }
  0x12   : > { %s317_s27 = sshll.u32 %s469_s15, 7  ;;  %s316_s28 = sshll.u32 %s137_s26, 3 }
  0x13   : > { %s556_s4 = scalar_lea.hbm %s644_s0, %s317_s27  ;;  %s141_s5 = scalar_lea.vmem [#allocation2], %s316_s28 }
  0x14   : > { %s148_s6 = sshll.u32 %s141_s5, 4  ;;  %p560_p13 = pnand %p339_p10, %p532_p5  ;;  %s564_s6 = int_to_ptr.vmem [resolvable:$true] %s148_s6 }
  0x15   : > { %s138_s8 = scalar_lea.sflag [#allocation3], %s137_s26  ;;  %s377_s9 = scalar_lea.hbm %s556_s4, 128 }
  0x16   : > { %p378_p2 = scmp.ne.s32.totalorder %s556_s4, %s377_s9  ;;  %p379_p3 = pneg %p560_p13 }
  0x17   : > { %s382_s17 = scalar_lea.hbm %s644_s0, 256  ;;  %p383_p5 = scmp.lt.s32.totalorder %s556_s4, %s644_s0 }
  0x18   : > { %p380_p4 = pnand %p379_p3, %p378_p2  ;;  %p384_p8 = scmp.lt.s32.totalorder %s382_s17, %s377_s9 }
  0x1a   : > { %p381_p7 = pneg %p380_p4  ;;  %p385_p10 = por %p384_p8, %p383_p5 }
  0x1c   : > { %p386_p9 = pnand %p385_p10, %p381_p7 }
  0x1e   : > { %389 = shalt.err (!%p386_p9)
}
  0x1f   : > { %s390_s22 = scalar_lea.vmem %s564_s6, 128  ;;  %s471_s26 = smov [#allocation2]  }
  0x20   : > { %p391_p0 = scmp.ne.s32.totalorder %s564_s6, %s390_s22  ;;  %s395_s27 = sshll.u32 %s471_s26, 4  ;;  %s396_s27 = int_to_ptr.vmem [resolvable:$false] %s395_s27 }
  0x21   : > { %s397_s28 = scalar_lea.vmem %s396_s27, 256  ;;  %p398_p4 = scmp.lt.s32.totalorder %s564_s6, %s396_s27 }
  0x22   : > { %p393_p1 = pnand %p391_p0, %p379_p3  ;;  %p399_p12 = scmp.lt.s32.totalorder %s397_s28, %s390_s22 }
  0x24   : > { %p394_p2 = pneg %p393_p1  ;;  %p400_p11 = por %p399_p12, %p398_p4 }
  0x26   : > { %p401_p6 = pnand %p400_p11, %p394_p2 }
  0x28   : > { %404 = shalt.err (!%p401_p6)
}
  0x29   : > { %334 = dma.hbm_to_vmem [thread:$0]  (!%p560_p13), %s556_s4, 128, %s564_s6, %s138_s8  }
  0x2a   : > { %p655_p9 = scmp.lt.s32.totalorder %s469_s15, 3  ;;  %p656_p7 = scmp.ge.s32.totalorder %s469_s15, 1 }
  0x2c   : > { %p154_p0 = pnand %p656_p7, %p655_p9 }
  0x2d   : > { %s591_s29 = sand.u32 (!%p154_p0), 1, %s461_s13   ;;  %p657_p6 = scmp.ne.s32.totalorder (!%p154_p0), %s651_s23, 0 }
  0x2e   : > { %157 = sbr.rel (%p154_p0) target bundleno = 391 (0x187), region = 32  ;;  %s319_s30 = sshll.u32 (!%p154_p0), %s591_s29, 3 }
  0x2f   : > { %s160_s5 = scalar_lea.sflag (!%p154_p0), [#allocation3], %s591_s29  ;;  %s163_s7 = scalar_lea.vmem (!%p154_p0), [#allocation2], %s319_s30 }
  0x33   : > { %448 = dma.done.wait (%p657_p6), %s160_s5, 128  }
  0x34   : > { %450 = vsyncadd (%p657_p6), %s160_s5, 4294967168  ;;  %v186_v0 = vld [vmem:[%s163_s7] sm:$0xff]  ;;  %v191_v1 = vlaneseq  ;;  %s324_s9 = sshll.u32 %s514_s16, 7  ;;  %s185_s10 = scalar_lea.vmem [#allocation5], %s319_s30 }
  0x35   : > { %187 = vadd.xlane.f32.xlu0 %v186_v0  ;;  %v321_v17 = vld [vmem:[%s645_s1] ss:$0 sm:$0xff]  ;;  %s243_s11 = sshll.u32 %s185_s10, 4  ;;  %s241_s20 = scalar_lea.hbm %s647_s3, %s324_s9  ;;  %s244_s11 = int_to_ptr.vmem [resolvable:$true] %s243_s11 }
  0x36   : > { %v192_v2 = vand.u32 127, %v191_v1  ;;  %v322_v19 = vld [vmem:[%s646_s2] ss:$0 sm:$0xff]  ;;  %s230_s22 = scalar_lea.sflag [#allocation4], %s591_s29  ;;  %s405_s26 = scalar_lea.vmem %s244_s11, 128 }
  0x37   : > { %p406_p11 = scmp.ne.s32.totalorder %s244_s11, %s405_s26  ;;  %p658_p12 = scmp.ne.s32.totalorder %s652_s24, 0 }
  0x38   : > { %vm193_vm0 = vcmp.lt.s32.totalorder %v192_v2, 32  ;;  %s472_s27 = smov [#allocation5]  }
  0x39   : > { %p407_p13 = pnand %p406_p11, %p658_p12  ;;  %s409_s28 = sshll.u32 %s472_s27, 4  ;;  %s410_s28 = int_to_ptr.vmem [resolvable:$false] %s409_s28 }
  0x3a   : > { %s411_s16 = scalar_lea.vmem %s410_s28, 256  ;;  %p412_p3 = scmp.lt.s32.totalorder %s244_s11, %s410_s28 }
  0x3b   : > { %p408_p1 = pneg %p407_p13  ;;  %p413_p5 = scmp.lt.s32.totalorder %s411_s16, %s405_s26 }
  0x3d   : > { %p414_p8 = por %p413_p5, %p412_p3 }
  0x3f   : > { %p415_p10 = pnand %p414_p8, %p408_p1 }
  0xbe   : > { %v188_v3 = vpop.xlane.xlu0 %187 }
  0xbf   : > { %v189_v4 = vmul.f32 0.03125, %v188_v3 }
  0xc1   : > { %v190_v5 = vsub.f32 %v186_v0, %v189_v4 }
  0xc3   : > { %v196_v6 = vsel %vm193_vm0, %v190_v5, 0.0 }
  0xc4   : > { %v197_v7 = vmul.f32 %v196_v6, %v196_v6 }
  0xc6   : > { %198 = vadd.xlane.f32.xlu0 %v197_v7 }
 0x14f   : > { %v199_v8 = vpop.xlane.xlu0 %198 }
 0x150   : > { %v200_v9 = vmul.f32 0.032258064, %v199_v8 }
 0x152   : > { %373 = vrsqrt.f32 %v200_v9  ;;  %vm203_vm1 = vcmp.eq.f32.partialorder %v200_v9, inf  ;;  %v206_v12 = vand.u32 2147483648, %v200_v9  ;;  %vm205_vm2 = vcmp.eq.f32.partialorder %v200_v9, 0.0 }
 0x15f   : > { %v374_v10 = vpop.eup %373 }
 0x160   : > { %v202_v11 = vmul.f32 %v374_v10, %v200_v9 }
 0x162   : > { %v204_v13 = vsel %vm203_vm1, %v200_v9, %v202_v11 }
 0x163   : > { %v207_v14 = vsel %vm205_vm2, %v206_v12, %v204_v13 }
 0x164   : > { %v208_v15 = vadd.f32 1e-06, %v207_v14 }
 0x166   : > { %375 = vrcp.f32 %v208_v15 }
 0x173   : > { %v376_v16 = vpop.eup %375 }
 0x174   : > { %v211_v18 = vmul.f32 %v376_v16, %v190_v5 }
 0x176   : > { %v219_v20 = vmul.f32 %v321_v17, %v211_v18 }
 0x178   : > { %v227_v21 = vadd.f32 %v322_v19, %v219_v20 }
 0x17a   : > { %228 = vst [vmem:[%s185_s10] sm:$0xff] %v227_v21 }
 0x17b   : > { %418 = shalt.err (!%p415_p10)
}
 0x17c   : > { %s419_s30 = scalar_lea.hbm %s241_s20, 128  ;;  %s423_s7 = scalar_lea.hbm %s647_s3, 256 }
 0x17d   : > { %p420_p2 = scmp.ne.s32.totalorder %s241_s20, %s419_s30  ;;  %p424_p7 = scmp.lt.s32.totalorder %s241_s20, %s647_s3 }
 0x17e   : > { %p425_p0 = scmp.lt.s32.totalorder %s423_s7, %s419_s30 }
 0x17f   : > { %p421_p4 = pnand %p420_p2, %p658_p12 }
 0x180   : > { %p426_p6 = por %p425_p0, %p424_p7 }
 0x181   : > { %p422_p9 = pneg %p421_p4 }
 0x183   : > { %p427_p11 = pnand %p426_p6, %p422_p9 }
 0x185   : > { %430 = shalt.err (!%p427_p11)
}
 0x186   : > { %329 = dma.vmem_to_hbm [thread:$0]  (%p658_p12), %s244_s11, 128, %s241_s20, %s230_s22  }
 0x187 PF: > { %s255_s6 = sand.u32 1, %s457_s12   ;;  %p659_p13 = scmp.ne.s32.totalorder %s653_s25, 0 }
 0x188   : > { %p660_p1 = scmp.ge.s32.totalorder %s469_s15, 2  ;;  %s256_s8 = scalar_lea.sflag [#allocation4], %s255_s6 }
 0x18a   : > { %p336_p3 = pnand %p660_p1, %p659_p13 }
 0x18c   : > { %p337_p5 = pneg %p336_p3 }
 0x18e   : > { %452 = dma.done.wait (%p337_p5), %s256_s8, 128  }
 0x18f   : > { %454 = vsyncadd (%p337_p5), %s256_s8, 4294967168  ;;  %p16_p8 = scmp.ge.s32.totalorder %s518_s18, 4   ;;  %s661_s12 = smov %s461_s13 }
 0x190   : > { %s662_s13 = smov %s465_s14  ;;  %s663_s14 = smov %s530_s21 }
 0x191   : > { %s664_s15 = smov %s518_s18  ;;  %18 = sbr.rel (!%p16_p8) target bundleno = 5 (0x5), region = 77 }
 0x196   :  { %261 = vsyncpa [#allocation3], 1 }
 0x197   :  { %263 = vsyncpa [#allocation3 + $0x1], 1 }
 0x198   :  { %264 = vsyncpa [#allocation4], 1 }
 0x199   :  { %266 = vsyncpa [#allocation4 + $0x1], 1 }

</bundles_post_ra>
